<compile_context>
chip_gen: v5e
topology: v5e:2x2
jax: 0.10.0
libtpu: 0.0.40
codegen_flags: <defaults>
</compile_context>

<pallas_src>
import jax
import jax.numpy as jnp
from jax.experimental import pallas as pl
from jax.experimental.pallas import tpu as pltpu

LANE = 128
_MIN_STEP_BYTES = 512 * 1024  # keep >= ~0.5 MiB of traffic per grid step


def _round_up(x, m):
    return ((x + m - 1) // m) * m


def _sublane_pack(dtype) -> int:
    itemsize = jnp.dtype(dtype).itemsize
    return max(8, 32 // max(itemsize, 1))  # 8 f32, 16 bf16, 32 int8/fp8


def _vmem_budgets():
    """(working-set budget, vmem_limit_bytes) tuned per TPU generation."""
    try:
        cap = pltpu.get_tpu_info().vmem_capacity_bytes
    except Exception:
        cap = 128 * 1024 * 1024
    if cap <= 64 * 1024 * 1024:                    # v7x: 64 MiB physical VMEM
        return 20 * 1024 * 1024, 32 * 1024 * 1024
    return 32 * 1024 * 1024, 64 * 1024 * 1024      # v5e / v6e: 128 MiB physical


def _cat_kernel(*refs):
    """Concat input tiles in-register; issue ONE lane-dense output store."""
    *in_refs, out_ref = refs
    out_ref[...] = jnp.concatenate(
        [r[...].astype(out_ref.dtype) for r in in_refs], axis=-1)


def pallas_cat_last_dim(xs, *, vmem_budget_bytes=None):
    """Concatenate arrays along the last axis (torch.cat(dim=-1)) via Pallas.

    All arrays must share the same leading shape; dtypes are promoted
    (in-kernel) to their common result type, matching torch.cat semantics.
    """
    xs = list(xs)
    if len(xs) == 1:
        return xs[0]

    lead_shape = xs[0].shape[:-1]
    for x in xs:
        if x.shape[:-1] != lead_shape:
            raise ValueError("leading dims must match for cat(dim=-1)")

    out_dtype = jnp.result_type(*[x.dtype for x in xs])
    out_itemsize = jnp.dtype(out_dtype).itemsize

    rows = 1
    for d in lead_shape:
        rows *= d
    widths = [x.shape[-1] for x in xs]
    total_w = sum(widths)

    # Flatten leading dims (metadata-only reshape; the copy happens in-kernel).
    xs2d = [x.reshape(rows, w) for x, w in zip(xs, widths)]

    budget, vmem_limit = _vmem_budgets()
    if vmem_budget_bytes is not None:
        budget = vmem_budget_bytes

    # --- Per-row VMEM footprint WITH 128-lane padding (blocks physically
    #     occupy full (8,128) tiles), inputs at native dtypes + output. ---
    bytes_per_row = sum(
        _round_up(w, LANE) * jnp.dtype(x.dtype).itemsize
        for w, x in zip(widths, xs2d))
    bytes_per_row += _round_up(total_w, LANE) * out_itemsize

    pack = max([_sublane_pack(out_dtype)] + [_sublane_pack(x.dtype) for x in xs2d])

    # Rows that fit a double-buffered working set inside the budget.
    tile_r = budget // (2 * bytes_per_row)
    tile_r = max(pack, (tile_r // pack) * pack)

    if tile_r >= rows:
        # Don't collapse to grid=(1,) when the problem is big enough to split:
        # gives both v7x TensorCores work and lets the pipeline overlap DMA
        # with the copy.  The byte floor keeps every per-step DMA burst-sized
        # (replaces the old hard 4096-row cap).
        n_blocks = min(
            4,
            max(1, (rows * bytes_per_row) // _MIN_STEP_BYTES),
            max(1, rows // pack),
        )
        if n_blocks <= 1:
            tile_r = rows  # full-extent block (always layout-legal)
        else:
            tile_r = _round_up(pl.cdiv(rows, n_blocks), pack)
            if tile_r >= rows:
                tile_r = rows

    grid = (pl.cdiv(rows, tile_r),)

    cost = pl.CostEstimate(
        flops=0,
        transcendentals=0,
        bytes_accessed=sum(x.size * jnp.dtype(x.dtype).itemsize for x in xs2d)
        + rows * total_w * out_itemsize,
    )

    out2d = pl.pallas_call(
        _cat_kernel,
        out_shape=jax.ShapeDtypeStruct((rows, total_w), out_dtype),
        grid=grid,
        in_specs=[pl.BlockSpec((tile_r, w), lambda i: (i, 0)) for w in widths],
        out_specs=pl.BlockSpec((tile_r, total_w), lambda i: (i, 0)),
        compiler_params=pltpu.CompilerParams(
            dimension_semantics=("parallel",),   # v7x: shard row tiles over 2 TCs
            vmem_limit_bytes=vmem_limit,
        ),
        cost_estimate=cost,
    )(*xs2d)

    return out2d.reshape(*lead_shape, total_w)


if __name__ == "__main__":
    key = jax.random.PRNGKey(0)
    k1, k2, k3, k4, k5, k6, k7 = jax.random.split(key, 7)

    # --- Test 1: small NCHW inputs differing only in the last (concat) dim. ---
    a = jax.random.normal(k1, (2, 4, 16, 16), dtype=jnp.float32)
    b = jax.random.normal(k2, (2, 4, 16, 32), dtype=jnp.float32)
    c = jax.random.normal(k3, (2, 4, 16, 48), dtype=jnp.float32)

    out = pallas_cat_last_dim([a, b, c])
    out = jax.block_until_ready(out)
    ref = jnp.concatenate([a, b, c], axis=-1)
    assert out.shape == (2, 4, 16, 96)
    assert out.dtype == jnp.float32
    assert bool(jnp.array_equal(out, ref))

    # --- Test 2: force a multi-tile grid with a partial last row-tile to
    #     exercise the pipelined / clipped-edge path (rows=160, tile_r=48). ---
    d = jax.random.normal(k4, (2, 4, 20, 16), dtype=jnp.float32)
    e = jax.random.normal(k5, (2, 4, 20, 48), dtype=jnp.float32)
    out2 = pallas_cat_last_dim([d, e], vmem_budget_bytes=148 * 1024)
    out2 = jax.block_until_ready(out2)
    ref2 = jnp.concatenate([d, e], axis=-1)
    assert out2.shape == (2, 4, 20, 64)
    assert bool(jnp.array_equal(out2, ref2))

    # --- Test 3: mixed dtypes -> in-kernel promotion (bf16 + f32 -> f32). ---
    f = jax.random.normal(k6, (2, 4, 16, 32), dtype=jnp.bfloat16)
    g = jax.random.normal(k7, (2, 4, 16, 16), dtype=jnp.float32)
    out3 = pallas_cat_last_dim([f, g])
    out3 = jax.block_until_ready(out3)
    ref3 = jnp.concatenate([f, g], axis=-1)
    assert out3.shape == (2, 4, 16, 48)
    assert out3.dtype == jnp.float32
    assert bool(jnp.array_equal(out3, ref3))

    print("KERNEL_OK")
</pallas_src>

<mosaic_0001>
module attributes {stable_mosaic.version = 11 : i64} {
  func.func @_cat_kernel(%arg0: i32, %arg1: memref<128x16xf32, #tpu.memory_space<vmem>>, %arg2: memref<128x32xf32, #tpu.memory_space<vmem>>, %arg3: memref<128x48xf32, #tpu.memory_space<vmem>>, %arg4: memref<128x96xf32, #tpu.memory_space<vmem>>) attributes {dimension_semantics = [#tpu.dimension_semantics<parallel>], iteration_bounds = array<i64: 1>, scalar_prefetch = 0 : i64, scratch_operands = 0 : i64, tpu.core_type = #tpu.core_type<tc>, window_params = [{transform_indices = @transform_0, window_bounds = array<i64: 128, 16>}, {transform_indices = @transform_1, window_bounds = array<i64: 128, 32>}, {transform_indices = @transform_2, window_bounds = array<i64: 128, 48>}, {transform_indices = @transform_3, window_bounds = array<i64: 128, 96>}]} {
    %c0 = arith.constant 0 : index
    %c0_0 = arith.constant 0 : index
    %0 = vector.load %arg1[%c0, %c0_0] : memref<128x16xf32, #tpu.memory_space<vmem>>, vector<128x16xf32>
    %c0_1 = arith.constant 0 : index
    %c0_2 = arith.constant 0 : index
    %1 = vector.load %arg2[%c0_1, %c0_2] : memref<128x32xf32, #tpu.memory_space<vmem>>, vector<128x32xf32>
    %c0_3 = arith.constant 0 : index
    %c0_4 = arith.constant 0 : index
    %2 = vector.load %arg3[%c0_3, %c0_4] : memref<128x48xf32, #tpu.memory_space<vmem>>, vector<128x48xf32>
    %3 = tpu.concatenate %0, %1, %2 in 1 : vector<128x16xf32>, vector<128x32xf32>, vector<128x48xf32> -> vector<128x96xf32>
    %c0_5 = arith.constant 0 : index
    %c0_6 = arith.constant 0 : index
    %4 = vector.load %arg4[%c0_5, %c0_6] : memref<128x96xf32, #tpu.memory_space<vmem>>, vector<128x96xf32>
    tpu.vector_store %arg4[%c0_5, %c0_6], %3 {strides = array<i32>} : memref<128x96xf32, #tpu.memory_space<vmem>>, vector<128x96xf32>,
    return
  }
  func.func @transform_0(%arg0: i32) -> (i32, i32) {
    %c0_i32 = arith.constant 0 : i32
    %c0_i32_0 = arith.constant 0 : i32
    return %arg0, %c0_i32 : i32, i32
  }
  func.func @transform_1(%arg0: i32) -> (i32, i32) {
    %c0_i32 = arith.constant 0 : i32
    %c0_i32_0 = arith.constant 0 : i32
    return %arg0, %c0_i32 : i32, i32
  }
  func.func @transform_2(%arg0: i32) -> (i32, i32) {
    %c0_i32 = arith.constant 0 : i32
    %c0_i32_0 = arith.constant 0 : i32
    return %arg0, %c0_i32 : i32, i32
  }
  func.func @transform_3(%arg0: i32) -> (i32, i32) {
    %c0_i32 = arith.constant 0 : i32
    %c0_i32_0 = arith.constant 0 : i32
    return %arg0, %c0_i32 : i32, i32
  }
}

</mosaic_0001>

<bundles_post_ra>
// kernel: tpu_custom_call.1
= control target key start
LH: loop header
LB: loop body
LE: loop exit
PB: predicated region body
PF: predicated region fallthrough
CT: control target
= control target key end

     0   :  { %s247_s18 = smov 16   ;;  %s248_s23 = smov 48   ;;  %vm207_vm0 = vcmask 392192   ;;  %vm190_vm1 = vcmask 130048   ;;  %vm224_vm2 = vcmask 785408   ;;  %s553_s1 = inlined_call_operand.vmem [shape: f32[128,32], index: 1, kind: input, shape index: {}]   ;;  %s554_s2 = inlined_call_operand.vmem [shape: f32[128,48], index: 2, kind: input, shape index: {}]   ;;  %s555_s0 = inlined_call_operand.vmem [shape: f32[128,16], index: 0, kind: input, shape index: {}]   ;;  %s556_s3 = inlined_call_operand.vmem [shape: f32[128,96], index: 3, kind: output, shape index: {}]  }
   0x1   :  { %v34_v0 = vld [vmem:[%s553_s1 + $0x20] sm:$0xff]  ;;  %v32_v1 = vld [vmem:[%s553_s1 + $0x10] sm:$0xff]  ;;  %v35_v3 = vld [vmem:[%s553_s1 + $0x28] sm:$0xff] }
   0x2   :  { %v30_v2 = vld [vmem:[%s553_s1] sm:$0xff]  ;;  %86 = vrot.lane.b32.xlu2 %v34_v0, %s247_s18  ;;  %82 = vrot.lane.b32.xlu1 %v32_v1, %s247_s18  ;;  %v33_v4 = vld [vmem:[%s553_s1 + $0x18] sm:$0xff] }
   0x3   :  { %78 = vrot.lane.b32.xlu0 %v30_v2, %s247_s18  ;;  %v31_v5 = vld [vmem:[%s553_s1 + $0x8] sm:$0xff]  ;;  %v38_v6 = vld [vmem:[%s553_s1 + $0x40] sm:$0xff]  ;;  %v37_v7 = vld [vmem:[%s553_s1 + $0x38] sm:$0xff] }
   0x4   :  { %v36_v8 = vld [vmem:[%s553_s1 + $0x30] sm:$0xff]  ;;  %v41_v9 = vld [vmem:[%s553_s1 + $0x58] sm:$0xff]  ;;  %v39_v11 = vld [vmem:[%s553_s1 + $0x48] sm:$0xff] }
   0x5   :  { %v40_v10 = vld [vmem:[%s553_s1 + $0x50] sm:$0xff]  ;;  %v43_v13 = vld [vmem:[%s553_s1 + $0x68] sm:$0xff]  ;;  %v42_v14 = vld [vmem:[%s553_s1 + $0x60] sm:$0xff] }
   0x6   :  { %v44_v12 = vld [vmem:[%s553_s1 + $0x70] sm:$0xff]  ;;  %v47_v15 = vld [vmem:[%s554_s2 + $0x8] sm:$0xff]  ;;  %v46_v16 = vld [vmem:[%s554_s2] sm:$0xff] }
   0x7   :  { %v45_v17 = vld [vmem:[%s553_s1 + $0x78] sm:$0xff]  ;;  %v50_v18 = vld [vmem:[%s554_s2 + $0x20] sm:$0xff]  ;;  %v48_v20 = vld [vmem:[%s554_s2 + $0x10] sm:$0xff] }
   0x8   :  { %v49_v19 = vld [vmem:[%s554_s2 + $0x18] sm:$0xff]  ;;  %v52_v22 = vld [vmem:[%s554_s2 + $0x30] sm:$0xff]  ;;  %v51_v23 = vld [vmem:[%s554_s2 + $0x28] sm:$0xff] }
   0x9   :  { %v53_v21 = vld [vmem:[%s554_s2 + $0x38] sm:$0xff]  ;;  %v56_v24 = vld [vmem:[%s554_s2 + $0x50] sm:$0xff]  ;;  %v55_v25 = vld [vmem:[%s554_s2 + $0x48] sm:$0xff] }
   0xa   :  { %88 = vrot.lane.b32.xlu2 %v35_v3, %s247_s18  ;;  %84 = vrot.lane.b32.xlu1 %v33_v4, %s247_s18  ;;  %v54_v26 = vld [vmem:[%s554_s2 + $0x40] sm:$0xff]  ;;  %v59_v27 = vld [vmem:[%s554_s2 + $0x68] sm:$0xff] }
   0xb   :  { %80 = vrot.lane.b32.xlu0 %v31_v5, %s247_s18  ;;  %v58_v28 = vld [vmem:[%s554_s2 + $0x60] sm:$0xff]  ;;  %v57_v29 = vld [vmem:[%s554_s2 + $0x58] sm:$0xff]  ;;  %v60_v31 = vld [vmem:[%s554_s2 + $0x70] sm:$0xff] }
   0xc   :  { %v61_v30 = vld [vmem:[%s554_s2 + $0x78] sm:$0xff]  ;;  %v15_v41 = vld [vmem:[%s555_s0 + $0x8] sm:$0xff]  ;;  %v18_v47 = vld [vmem:[%s555_s0 + $0x20] sm:$0xff] }
   0xd   :  { %v21_v53 = vld [vmem:[%s555_s0 + $0x38] sm:$0xff]  ;;  %v14_v59 = vld [vmem:[%s555_s0] sm:$0xff]  ;;  %v24_v60 = vld [vmem:[%s555_s0 + $0x50] sm:$0xff] }
   0xe   :  { %v17_v4 = vld [vmem:[%s555_s0 + $0x18] sm:$0xff]  ;;  %v27_v5 = vld [vmem:[%s555_s0 + $0x68] sm:$0xff] }
  0x12   :  { %94 = vrot.lane.b32.xlu2 %v38_v6, %s247_s18  ;;  %92 = vrot.lane.b32.xlu1 %v37_v7, %s247_s18  ;;  %v16_v6 = vld [vmem:[%s555_s0 + $0x10] sm:$0xff] }
  0x13   :  { %90 = vrot.lane.b32.xlu0 %v36_v8, %s247_s18 }
  0x1a   :  { %100 = vrot.lane.b32.xlu2 %v41_v9, %s247_s18  ;;  %98 = vrot.lane.b32.xlu1 %v40_v10, %s247_s18 }
  0x1b   :  { %96 = vrot.lane.b32.xlu0 %v39_v11, %s247_s18 }
  0x22   :  { %106 = vrot.lane.b32.xlu2 %v44_v12, %s247_s18  ;;  %104 = vrot.lane.b32.xlu1 %v43_v13, %s247_s18 }
  0x23   :  { %102 = vrot.lane.b32.xlu0 %v42_v14, %s247_s18 }
  0x2a   :  { %144 = vrot.lane.b32.xlu2 %v47_v15, %s248_s23  ;;  %142 = vrot.lane.b32.xlu1 %v46_v16, %s248_s23  ;;  %v20_v16 = vld [vmem:[%s555_s0 + $0x30] sm:$0xff] }
  0x2b   :  { %108 = vrot.lane.b32.xlu0 %v45_v17, %s247_s18  ;;  %v19_v17 = vld [vmem:[%s555_s0 + $0x28] sm:$0xff] }
  0x32   :  { %150 = vrot.lane.b32.xlu2 %v50_v18, %s248_s23  ;;  %148 = vrot.lane.b32.xlu1 %v49_v19, %s248_s23 }
  0x33   :  { %146 = vrot.lane.b32.xlu0 %v48_v20, %s248_s23 }
  0x3a   :  { %156 = vrot.lane.b32.xlu2 %v53_v21, %s248_s23  ;;  %154 = vrot.lane.b32.xlu1 %v52_v22, %s248_s23 }
  0x3b   :  { %152 = vrot.lane.b32.xlu0 %v51_v23, %s248_s23 }
  0x42   :  { %162 = vrot.lane.b32.xlu2 %v56_v24, %s248_s23  ;;  %160 = vrot.lane.b32.xlu1 %v55_v25, %s248_s23  ;;  %v23_v24 = vld [vmem:[%s555_s0 + $0x48] sm:$0xff]  ;;  %v22_v25 = vld [vmem:[%s555_s0 + $0x40] sm:$0xff] }
  0x43   :  { %158 = vrot.lane.b32.xlu0 %v54_v26, %s248_s23 }
  0x4a   :  { %168 = vrot.lane.b32.xlu2 %v59_v27, %s248_s23  ;;  %166 = vrot.lane.b32.xlu1 %v58_v28, %s248_s23 }
  0x4b   :  { %164 = vrot.lane.b32.xlu0 %v57_v29, %s248_s23 }
  0x52   :  { %172 = vrot.lane.b32.xlu1 %v61_v30, %s248_s23 }
  0x53   :  { %170 = vrot.lane.b32.xlu0 %v60_v31, %s248_s23 }
  0x5c   :  { %v87_v32 = vpop.permute.xlu2 %86 }
  0x5d   :  { %v195_v48 = vsel %vm190_vm1, %v18_v47, %v87_v32  ;;  %v26_v32 = vld [vmem:[%s555_s0 + $0x60] sm:$0xff] }
  0x64   :  { %v397_v33 = vpop.permute.xlu2 %88 }
  0x65   :  { %v196_v20 = vsel %vm190_vm1, %v19_v17, %v397_v33  ;;  %v25_v33 = vld [vmem:[%s555_s0 + $0x58] sm:$0xff] }
  0x6c   :  { %v399_v34 = vpop.permute.xlu2 %94 }
  0x6d   :  { %v199_v28 = vsel %vm190_vm1, %v22_v25, %v399_v34 }
  0x74   :  { %v401_v35 = vpop.permute.xlu2 %100  ;;  %v83_v36 = vpop.permute.xlu1 %82 }
  0x75   :  { %v79_v37 = vpop.permute.xlu0 %78  ;;  %v193_v11 = vsel %vm190_vm1, %v16_v6, %v83_v36 }
  0x76   :  { %v191_v61 = vsel %vm190_vm1, %v14_v59, %v79_v37  ;;  %v202_v37 = vsel %vm190_vm1, %v25_v33, %v401_v35  ;;  %v28_v35 = vld [vmem:[%s555_s0 + $0x70] sm:$0xff] }
  0x7c   :  { %v403_v38 = vpop.permute.xlu2 %106  ;;  %v85_v39 = vpop.permute.xlu1 %84 }
  0x7d   :  { %v81_v40 = vpop.permute.xlu0 %80  ;;  %v194_v7 = vsel %vm190_vm1, %v17_v4, %v85_v39 }
  0x7e   :  { %v192_v42 = vsel %vm190_vm1, %v15_v41, %v81_v40 }
  0x84   :  { %v145_v43 = vpop.permute.xlu2 %144  ;;  %v93_v44 = vpop.permute.xlu1 %92 }
  0x85   :  { %v209_v45 = vsel %vm207_vm0, %v192_v42, %v145_v43  ;;  %v91_v46 = vpop.permute.xlu0 %90  ;;  %v198_v54 = vsel %vm190_vm1, %v21_v53, %v93_v44  ;;  %v29_v42 = vld [vmem:[%s555_s0 + $0x78] sm:$0xff] }
  0x86   :  { %226 = vst.msk [vmem:[%s556_s3 + $0x8] sm:$0xff] %vm224_vm2, %v209_v45  ;;  %v197_v18 = vsel %vm190_vm1, %v20_v16, %v91_v46  ;;  %v205_v45 = vsel %vm190_vm1, %v28_v35, %v403_v38 }
  0x8c   :  { %v151_v49 = vpop.permute.xlu2 %150  ;;  %v99_v50 = vpop.permute.xlu1 %98 }
  0x8d   :  { %v212_v51 = vsel %vm207_vm0, %v195_v48, %v151_v49  ;;  %v97_v52 = vpop.permute.xlu0 %96  ;;  %v201_v62 = vsel %vm190_vm1, %v24_v60, %v99_v50 }
  0x8e   :  { %229 = vst.msk [vmem:[%s556_s3 + $0x20] sm:$0xff] %vm224_vm2, %v212_v51  ;;  %v200_v26 = vsel %vm190_vm1, %v23_v24, %v97_v52 }
  0x94   :  { %v157_v55 = vpop.permute.xlu2 %156  ;;  %v105_v56 = vpop.permute.xlu1 %104 }
  0x95   :  { %v215_v57 = vsel %vm207_vm0, %v198_v54, %v157_v55  ;;  %v103_v58 = vpop.permute.xlu0 %102  ;;  %v204_v8 = vsel %vm190_vm1, %v27_v5, %v105_v56 }
  0x96   :  { %232 = vst.msk [vmem:[%s556_s3 + $0x38] sm:$0xff] %vm224_vm2, %v215_v57  ;;  %v203_v34 = vsel %vm190_vm1, %v26_v32, %v103_v58 }
  0x9c   :  { %v163_v63 = vpop.permute.xlu2 %162  ;;  %v143_v0 = vpop.permute.xlu1 %142 }
  0x9d   :  { %v218_v1 = vsel %vm207_vm0, %v201_v62, %v163_v63  ;;  %v208_v2 = vsel %vm207_vm0, %v191_v61, %v143_v0  ;;  %v109_v3 = vpop.permute.xlu0 %108 }
  0x9e   :  { %235 = vst.msk [vmem:[%s556_s3 + $0x50] sm:$0xff] %vm224_vm2, %v218_v1  ;;  %v206_v43 = vsel %vm190_vm1, %v29_v42, %v109_v3 }
  0x9f   :  { %225 = vst.msk [vmem:[%s556_s3] sm:$0xff] %vm224_vm2, %v208_v2 }
  0xa4   :  { %v169_v9 = vpop.permute.xlu2 %168  ;;  %v149_v10 = vpop.permute.xlu1 %148 }
  0xa5   :  { %v221_v12 = vsel %vm207_vm0, %v204_v8, %v169_v9  ;;  %v211_v13 = vsel %vm207_vm0, %v194_v7, %v149_v10  ;;  %v147_v14 = vpop.permute.xlu0 %146 }
  0xa6   :  { %238 = vst.msk [vmem:[%s556_s3 + $0x68] sm:$0xff] %vm224_vm2, %v221_v12  ;;  %v210_v15 = vsel %vm207_vm0, %v193_v11, %v147_v14 }
  0xa7   :  { %228 = vst.msk [vmem:[%s556_s3 + $0x18] sm:$0xff] %vm224_vm2, %v211_v13 }
  0xa8   :  { %227 = vst.msk [vmem:[%s556_s3 + $0x10] sm:$0xff] %vm224_vm2, %v210_v15 }
  0xac   :  { %v155_v19 = vpop.permute.xlu1 %154 }
  0xad   :  { %v214_v21 = vsel %vm207_vm0, %v197_v18, %v155_v19  ;;  %v153_v22 = vpop.permute.xlu0 %152 }
  0xae   :  { %231 = vst.msk [vmem:[%s556_s3 + $0x30] sm:$0xff] %vm224_vm2, %v214_v21  ;;  %v213_v23 = vsel %vm207_vm0, %v196_v20, %v153_v22 }
  0xaf   :  { %230 = vst.msk [vmem:[%s556_s3 + $0x28] sm:$0xff] %vm224_vm2, %v213_v23 }
  0xb4   :  { %v161_v27 = vpop.permute.xlu1 %160 }
  0xb5   :  { %v217_v29 = vsel %vm207_vm0, %v200_v26, %v161_v27  ;;  %v159_v30 = vpop.permute.xlu0 %158 }
  0xb6   :  { %234 = vst.msk [vmem:[%s556_s3 + $0x48] sm:$0xff] %vm224_vm2, %v217_v29  ;;  %v216_v31 = vsel %vm207_vm0, %v199_v28, %v159_v30 }
  0xb7   :  { %233 = vst.msk [vmem:[%s556_s3 + $0x40] sm:$0xff] %vm224_vm2, %v216_v31 }
  0xbc   :  { %v167_v36 = vpop.permute.xlu1 %166 }
  0xbd   :  { %v220_v39 = vsel %vm207_vm0, %v203_v34, %v167_v36  ;;  %v165_v40 = vpop.permute.xlu0 %164 }
  0xbe   :  { %237 = vst.msk [vmem:[%s556_s3 + $0x60] sm:$0xff] %vm224_vm2, %v220_v39  ;;  %v219_v41 = vsel %vm207_vm0, %v202_v37, %v165_v40 }
  0xbf   :  { %236 = vst.msk [vmem:[%s556_s3 + $0x58] sm:$0xff] %vm224_vm2, %v219_v41 }
  0xc4   :  { %v173_v44 = vpop.permute.xlu1 %172 }
  0xc5   :  { %v223_v46 = vsel %vm207_vm0, %v206_v43, %v173_v44  ;;  %v171_v47 = vpop.permute.xlu0 %170 }
  0xc6   :  { %240 = vst.msk [vmem:[%s556_s3 + $0x78] sm:$0xff] %vm224_vm2, %v223_v46  ;;  %v222_v48 = vsel %vm207_vm0, %v205_v45, %v171_v47 }
  0xc7   :  { %239 = vst.msk [vmem:[%s556_s3 + $0x70] sm:$0xff] %vm224_vm2, %v222_v48 }

</bundles_post_ra>
